<compile_context>
chip_gen: v6e
topology: v6e:2x2x1
jax: 0.10.0
libtpu: 0.0.40
codegen_flags: <defaults>
</compile_context>

<pallas_src>
import jax
import jax.numpy as jnp
from jax.experimental import pallas as pl
from jax.experimental.pallas import tpu as pltpu


def _make_wlp_kernel(num_layers):
    """out_tile = sum_l w[l] * x_l_tile   (w already normalized; f32 accumulate)."""

    def kernel(w_ref, *refs):
        # w_ref : SMEM (Lu,) f32 -- scalar-prefetched, pre-normalized layer weights.
        # refs  : Lu input tiles (TM, W) followed by the output tile (TM, W).
        x_refs = refs[:num_layers]
        o_ref = refs[num_layers]
        acc = w_ref[0] * x_refs[0][...].astype(jnp.float32)
        for l in range(1, num_layers):
            acc = acc + w_ref[l] * x_refs[l][...].astype(jnp.float32)
        o_ref[...] = acc.astype(o_ref.dtype)

    return kernel


def _vmem_limit_bytes():
    """Per-generation scoped-VMEM limit: ~half of physical VMEM, capped at 64 MiB.

    -> 64 MiB on v5e/v6e (128 MiB physical), 32 MiB on v7x (64 MiB physical per TC)."""
    cap = None
    try:
        info = pltpu.get_tpu_info()
        cap = getattr(info, "vmem_capacity_bytes", None)
    except Exception:
        cap = None
    if not cap:
        cap = 64 << 20  # conservative fallback, safe on every generation
    return int(min(cap // 2, 64 << 20))


def _choose_block_rows(rows, width, num_layers, in_itemsize, out_itemsize,
                       sublane, budget_bytes):
    """Largest row tile whose double-buffered inputs + output fit the VMEM budget,
    capped so the grid has >= 2 tiles whenever rows permit (v7x megacore sharding)."""
    per_row = 2 * num_layers * width * in_itemsize + 2 * width * out_itemsize
    tm = budget_bytes // max(per_row, 1)
    tm = max(sublane, (tm // sublane) * sublane)
    if rows > 2 * sublane:
        # Keep at least 2 grid tiles so ("parallel",) can use both v7x TensorCores.
        half = max(sublane, (rows // 2 // sublane) * sublane)
        tm = min(tm, half)
    if rows <= tm:
        return rows  # single full-array block: no (8,128) divisibility requirement
    return tm


def _lane_dense_view(B, S, H):
    """Copy-free 2-D view (R, W) of each contiguous (B,S,H) layer with W a multiple of 128
    when the total element count allows (the op is purely elementwise, so any view works)."""
    n = B * S * H
    if H % 128 == 0:
        return B * S, H
    if n % 128 == 0:
        w = 128
        while n % (w * 2) == 0 and w * 2 <= 16384:
            w *= 2
        return n // w, w
    # Fallback: (B*S, H) with masked partial stores -- still correct.
    return B * S, H


def weighted_layer_pooling(ft_all_layers, layer_weights, layer_start=4, out_dtype=None):
    """ft_all_layers: sequence of (B, S, H) arrays, length num_hidden_layer + 1.

    out_dtype=None matches torch's f32-weight promotion (f32 output); pass the input dtype
    explicitly to keep bf16 outputs. f32 accumulation happens inside the kernel either way.
    """
    used = list(ft_all_layers[layer_start:])        # only the layers we need; no stacked copy
    num_layers = len(used)
    B, S, H = used[0].shape
    in_dtype = used[0].dtype
    if out_dtype is None:
        out_dtype = jnp.promote_types(in_dtype, jnp.float32)

    # Lane-dense view of every layer (free reshape of a contiguous array).
    R, W = _lane_dense_view(B, S, H)
    flats = [x.reshape(R, W) for x in used]

    # Pre-normalize the weights on the XLA side; the kernel then only does the weighted sum.
    # (Divide-before-sum vs torch's divide-after-sum: last-ulp rounding difference only.)
    w = layer_weights.astype(jnp.float32)
    w = w / jnp.sum(w)

    in_itemsize = jnp.dtype(in_dtype).itemsize
    out_itemsize = jnp.dtype(out_dtype).itemsize
    sublane = max(8, 32 // in_itemsize)             # 8 for f32, 16 for bf16, 32 for int8/fp8

    vmem_limit = _vmem_limit_bytes()
    budget = int(0.8 * vmem_limit)                  # tiling budget consistent with the limit
    tm = _choose_block_rows(R, W, num_layers, in_itemsize, out_itemsize, sublane, budget)

    row_spec = lambda i, w_ref: (i, 0)              # same row tile for every layer and the output

    grid_spec = pltpu.PrefetchScalarGridSpec(
        num_scalar_prefetch=1,                      # layer weights land in SMEM
        grid=(pl.cdiv(R, tm),),                     # tile the row axis only; W stays lane-dense
        in_specs=[pl.BlockSpec((tm, W), row_spec) for _ in range(num_layers)],
        out_specs=pl.BlockSpec((tm, W), row_spec),
    )

    out = pl.pallas_call(
        _make_wlp_kernel(num_layers),
        out_shape=jax.ShapeDtypeStruct((R, W), out_dtype),
        grid_spec=grid_spec,
        compiler_params=pltpu.CompilerParams(
            dimension_semantics=("parallel",),      # independent row tiles -> megacore shard
            vmem_limit_bytes=vmem_limit,            # per-generation, matches the tiling budget
        ),
    )(w, *flats)
    return out.reshape(B, S, H)


if __name__ == "__main__":
    # Module config (matches nn.Parameter(torch.tensor([1]*(num_hidden_layer+1-layer_start)))).
    num_hidden_layer = 6
    layer_start = 4
    layer_weights = jnp.ones((num_hidden_layer + 1 - layer_start,), dtype=jnp.float32)

    # Small synthetic hidden states: (num_hidden_layer + 1) layers of (B, S, H).
    B, S, H = 2, 8, 32
    key = jax.random.PRNGKey(0)
    keys = jax.random.split(key, num_hidden_layer + 1)
    ft_all_layers = [
        jax.random.normal(k, (B, S, H), dtype=jnp.float32) for k in keys
    ]

    out = weighted_layer_pooling(ft_all_layers, layer_weights, layer_start)
    out = jax.block_until_ready(out)

    # Plain-JAX reference for a correctness sanity check (mirrors the torch forward).
    stacked = jnp.stack(ft_all_layers)[layer_start:]
    ref = (layer_weights[:, None, None, None] * stacked).sum(0) / layer_weights.sum()
    assert out.shape == (B, S, H)
    assert jnp.allclose(out, ref, atol=1e-5, rtol=1e-5)

    print("KERNEL_OK")
</pallas_src>

<mosaic_0001>
module attributes {stable_mosaic.version = 11 : i64} {
  func.func @kernel(%arg0: i32, %arg1: memref<3xf32, #tpu.memory_space<smem>>, %arg2: memref<1x512xf32, #tpu.memory_space<vmem>>, %arg3: memref<1x512xf32, #tpu.memory_space<vmem>>, %arg4: memref<1x512xf32, #tpu.memory_space<vmem>>, %arg5: memref<1x512xf32, #tpu.memory_space<vmem>>) attributes {dimension_semantics = [#tpu.dimension_semantics<parallel>], iteration_bounds = array<i64: 1>, scalar_prefetch = 1 : i64, scratch_operands = 0 : i64, tpu.core_type = #tpu.core_type<tc>, window_params = [{transform_indices = @transform_0, window_bounds = array<i64: 1, 512>}, {transform_indices = @transform_1, window_bounds = array<i64: 1, 512>}, {transform_indices = @transform_2, window_bounds = array<i64: 1, 512>}, {transform_indices = @transform_3, window_bounds = array<i64: 1, 512>}]} {
    %c0 = arith.constant 0 : index
    %0 = memref.load %arg1[%c0] : memref<3xf32, #tpu.memory_space<smem>>
    %c0_0 = arith.constant 0 : index
    %c0_1 = arith.constant 0 : index
    %1 = vector.load %arg2[%c0_0, %c0_1] : memref<1x512xf32, #tpu.memory_space<vmem>>, vector<1x512xf32>
    %2 = vector.broadcast %0 : f32 to vector<1x512xf32>
    %3 = arith.mulf %2, %1 : vector<1x512xf32>
    %c1 = arith.constant 1 : index
    %4 = memref.load %arg1[%c1] : memref<3xf32, #tpu.memory_space<smem>>
    %c0_2 = arith.constant 0 : index
    %c0_3 = arith.constant 0 : index
    %5 = vector.load %arg3[%c0_2, %c0_3] : memref<1x512xf32, #tpu.memory_space<vmem>>, vector<1x512xf32>
    %6 = vector.broadcast %4 : f32 to vector<1x512xf32>
    %7 = arith.mulf %6, %5 : vector<1x512xf32>
    %8 = arith.addf %3, %7 : vector<1x512xf32>
    %c2 = arith.constant 2 : index
    %9 = memref.load %arg1[%c2] : memref<3xf32, #tpu.memory_space<smem>>
    %c0_4 = arith.constant 0 : index
    %c0_5 = arith.constant 0 : index
    %10 = vector.load %arg4[%c0_4, %c0_5] : memref<1x512xf32, #tpu.memory_space<vmem>>, vector<1x512xf32>
    %11 = vector.broadcast %9 : f32 to vector<1x512xf32>
    %12 = arith.mulf %11, %10 : vector<1x512xf32>
    %13 = arith.addf %8, %12 : vector<1x512xf32>
    %c0_6 = arith.constant 0 : index
    %c0_7 = arith.constant 0 : index
    %14 = vector.load %arg5[%c0_6, %c0_7] : memref<1x512xf32, #tpu.memory_space<vmem>>, vector<1x512xf32>
    tpu.vector_store %arg5[%c0_6, %c0_7], %13 {strides = array<i32>} : memref<1x512xf32, #tpu.memory_space<vmem>>, vector<1x512xf32>,
    return
  }
  func.func @transform_0(%arg0: i32, %arg1: memref<3xf32, #tpu.memory_space<smem>>) -> (i32, i32) {
    %c0_i32 = arith.constant 0 : i32
    %c0_i32_0 = arith.constant 0 : i32
    return %arg0, %c0_i32 : i32, i32
  }
  func.func @transform_1(%arg0: i32, %arg1: memref<3xf32, #tpu.memory_space<smem>>) -> (i32, i32) {
    %c0_i32 = arith.constant 0 : i32
    %c0_i32_0 = arith.constant 0 : i32
    return %arg0, %c0_i32 : i32, i32
  }
  func.func @transform_2(%arg0: i32, %arg1: memref<3xf32, #tpu.memory_space<smem>>) -> (i32, i32) {
    %c0_i32 = arith.constant 0 : i32
    %c0_i32_0 = arith.constant 0 : i32
    return %arg0, %c0_i32 : i32, i32
  }
  func.func @transform_3(%arg0: i32, %arg1: memref<3xf32, #tpu.memory_space<smem>>) -> (i32, i32) {
    %c0_i32 = arith.constant 0 : i32
    %c0_i32_0 = arith.constant 0 : i32
    return %arg0, %c0_i32 : i32, i32
  }
}

</mosaic_0001>

<bundles_post_ra>
// kernel: tpu_custom_call.1
= control target key start
LH: loop header
LB: loop body
LE: loop exit
PB: predicated region body
PF: predicated region fallthrough
CT: control target
= control target key end

     0   :  { %s161_s15 = smov [#allocation3]   ;;  %s205_s0 = inlined_call_operand.hbm [shape: f32[3], index: 0, kind: input, shape index: {}]   ;;  %s206_s1 = inlined_call_operand.hbm [shape: f32[1,512], index: 1, kind: input, shape index: {}]   ;;  %s207_s2 = inlined_call_operand.hbm [shape: f32[1,512], index: 2, kind: input, shape index: {}]   ;;  %s208_s3 = inlined_call_operand.vmem [shape: f32[1,512], index: 3, kind: input, shape index: {}]   ;;  %s209_s4 = inlined_call_operand.hbm [shape: f32[1,512], index: 4, kind: output, shape index: {}]  }
   0x1   :  { %10 = dma.hbm_to_smem %s205_s0, 16, %s161_s15, [#allocation2] }
   0x2   :  { %153 = dma.done.wait [#allocation2], 16 }
   0x3   :  { %154 = vsyncadd [#allocation2], 4294967280 }
   0x4   :  { %12 = sfence }
   0x5   :  { %13 = vsyncpa [#allocation5], 0 }
   0x6   :  { %14 = vsyncpa [#allocation8], 0 }
   0x7   :  { %15 = vsyncpa [#allocation6], 0  ;;  %s162_s18 = smov [#allocation4]   ;;  %s163_s20 = smov [#allocation7]  }
   0x8   :  { %s22_s19 = sshll.u32 %s162_s18, 4  ;;  %s32_s21 = sshll.u32 %s163_s20, 4  ;;  %s23_s19 = int_to_ptr.vmem [resolvable:$true] %s22_s19  ;;  %s33_s21 = int_to_ptr.vmem [resolvable:$true] %s32_s21 }
   0x9   :  { %s101_s22 = scalar_lea.vmem %s23_s19, 64  ;;  %p106_p1 = scmp.lt.s32.totalorder %s23_s19, %s23_s19 }
   0xa   :  { %p102_p0 = scmp.ne.s32.totalorder %s23_s19, %s101_s22  ;;  %p107_p2 = scmp.lt.s32.totalorder %s101_s22, %s101_s22 }
   0xc   :  { %p108_p3 = por %p107_p2, %p106_p1 }
   0xe   :  { %p109_p4 = pnand %p108_p3, %p102_p0 }
  0x10   :  { %112 = shalt.err (!%p109_p4)
}
  0x11   :  { %25 = dma.hbm_to_vmem [thread:$0]  %s206_s1, 64, %s23_s19, [#allocation5]  }
  0x12   :  { %s121_s24 = scalar_lea.vmem %s33_s21, 64  ;;  %p126_p6 = scmp.lt.s32.totalorder %s33_s21, %s33_s21 }
  0x13   :  { %p122_p5 = scmp.ne.s32.totalorder %s33_s21, %s121_s24  ;;  %p127_p7 = scmp.lt.s32.totalorder %s121_s24, %s121_s24 }
  0x15   :  { %p128_p8 = por %p127_p7, %p126_p6 }
  0x17   :  { %p129_p9 = pnand %p128_p8, %p122_p5 }
  0x19   :  { %132 = shalt.err (!%p129_p9)
}
  0x1a   :  { %35 = dma.hbm_to_vmem [thread:$0]  %s207_s2, 64, %s33_s21, [#allocation8]  }
  0x1b   :  { %155 = dma.done.wait [#allocation5], 64  }
  0x1c   :  { %156 = vsyncadd [#allocation5], 4294967232 }
  0x1d   :  { %157 = dma.done.wait [#allocation8], 64  }
  0x1e   :  { %158 = vsyncadd [#allocation8], 4294967232  ;;  %s44_s27 = sld [smem:[#allocation3]]  ;;  %v45_v0 = vld [vmem:[#allocation4] sm:$0xf]  ;;  %v58_v6 = vlaneseq  ;;  %s164_s2 = smov [#allocation9]  }
  0x1f   :  { %s79_s28 = sld [smem:[#allocation3 + $0x1]]  ;;  %v49_v2 = vld [vmem:[#allocation7] sm:$0xf]  ;;  %v54_v3 = vld [vmem:[%s208_s3] sm:$0xf]  ;;  %s69_s5 = sshll.u32 %s164_s2, 4  ;;  %s70_s5 = int_to_ptr.vmem [resolvable:$true] %s69_s5 }
  0x20   :  { %s80_s29 = sld [smem:[#allocation3 + $0x2]]  ;;  %vm60_vm0 = vcmp.lt.s32.totalorder %v58_v6, 512  ;;  %s133_s6 = scalar_lea.vmem %s70_s5, 64 }
  0x21   :  { %p134_p10 = scmp.ne.s32.totalorder %s70_s5, %s133_s6  ;;  %p138_p11 = scmp.lt.s32.totalorder %s70_s5, %s70_s5 }
  0x22   :  { %p139_p12 = scmp.lt.s32.totalorder %s133_s6, %s133_s6 }
  0x24   :  { %v46_v1 = vstv %s44_s27  ;;  %p140_p13 = por %p139_p12, %p138_p11 }
  0x25   :  { %v47_v4 = vmul.f32 %v46_v1, %v45_v0  ;;  %v50_v5 = vstv %s79_s28 }
  0x26   :  { %v51_v7 = vmul.f32 %v50_v5, %v49_v2  ;;  %v55_v8 = vstv %s80_s29  ;;  %p141_p0 = pnand %p140_p13, %p134_p10 }
  0x27   :  { %v56_v9 = vmul.f32 %v55_v8, %v54_v3 }
  0x28   :  { %v52_v10 = vadd.f32 %v51_v7, %v47_v4 }
  0x2a   :  { %v57_v11 = vadd.f32 %v56_v9, %v52_v10 }
  0x2c   :  { %62 = vst.msk [vmem:[#allocation9] sm:$0xf] %vm60_vm0, %v57_v11 }
  0x2d   :  { %144 = shalt.err (!%p141_p0)
}
  0x2e   :  { %72 = dma.vmem_to_hbm [thread:$0]  %s70_s5, 64, %s209_s4, [#allocation6]  }
  0x2f   :  { %159 = dma.done.wait [#allocation6], 64  }
  0x30   :  { %160 = vsyncadd [#allocation6], 4294967232 }
  0x31   :  { %76 = vsyncpa [#allocation5], 1 }
  0x32   :  { %77 = vsyncpa [#allocation8], 1 }
  0x33   :  { %78 = vsyncpa [#allocation6], 1 }

</bundles_post_ra>
